<compile_context>
chip_gen: v5e
topology: v5e:2x2
jax: 0.10.0
libtpu: 0.0.40
codegen_flags: <defaults>
</compile_context>

<pallas_src>
import jax
import jax.numpy as jnp
from jax.experimental import pallas as pl
from jax.experimental.pallas import tpu as pltpu

NEG_SLOPE = 0.01            # torch.nn.LeakyReLU default
BN_EPS = 1e-5               # torch.nn.BatchNorm2d default
VMEM_LIMIT = 32 * 1024 * 1024


def _leaky_relu(z):
    return jnp.where(z >= 0, z, NEG_SLOPE * z)


def _row_tile(total, quantum, target):
    """Largest multiple of `quantum` that divides `total` and is <= target
    (falls back to `total`)."""
    if total <= target:
        return total
    t = (target // quantum) * quantum
    if t <= 0:
        return total
    while t > quantum and total % t != 0:
        t -= quantum
    return t if (t > 0 and total % t == 0) else total


# ---------------------------------------------------------------------------
# Pallas kernels
# ---------------------------------------------------------------------------
def _make_conv_kernel(apply_prenorm: bool, H: int):
    """conv3x3(pad=1) on lane-folded rows (M = rows of all images stacked),
    optionally fusing the previous stage's BatchNorm-normalize + LeakyReLU
    onto the input tile.  Row tiles are multiples of H, so the vertical halo
    is handled entirely by per-image boundary masks inside the tile."""

    def kernel(*refs):
        if apply_prenorm:
            x_ref, wm_ref, b_ref, scale_ref, shift_ref, y_ref, stats_ref = refs
        else:
            x_ref, wm_ref, b_ref, y_ref, stats_ref = refs

        x = x_ref[...]                                  # (TM, W*Cin) f32
        TM, WCin = x.shape

        if apply_prenorm:
            # fused BN + LeakyReLU of the previous stage (folded scale/shift),
            # kept in f32 (v5e VPU has no bf16) before the bf16 cast.
            x = _leaky_relu(x * scale_ref[...] + shift_ref[...])

        xb = x.astype(jnp.bfloat16)                     # MXU operands in bf16

        # Vertical halo: shifted row stacks with zero rows at tile edges and
        # per-image boundary masks (row % H) -> zero padding in H, also
        # correct across image boundaries inside the flattened batch.
        row = jax.lax.broadcasted_iota(jnp.int32, (TM, 1), 0)
        rH = row % H
        zero_row = jnp.zeros((1, WCin), xb.dtype)
        x_up = jnp.concatenate([zero_row, xb[:-1, :]], axis=0)   # x_up[i] = x[i-1]
        x_dn = jnp.concatenate([xb[1:, :], zero_row], axis=0)    # x_dn[i] = x[i+1]
        x_up = jnp.where(rH == 0, 0.0, x_up)
        x_dn = jnp.where(rH == H - 1, 0.0, x_dn)

        # Three accumulating dots (K = W*Cin each) against the band weights;
        # the band structure encodes the three horizontal taps + W zero-pad.
        acc = jnp.dot(x_up, wm_ref[0], preferred_element_type=jnp.float32)
        acc = acc + jnp.dot(xb, wm_ref[1], preferred_element_type=jnp.float32)
        acc = acc + jnp.dot(x_dn, wm_ref[2], preferred_element_type=jnp.float32)
        acc = acc + b_ref[...]                           # (TM, W*Cout) f32

        y_ref[...] = acc

        # Per-tile partial BN stats, packed lane-dense as one (1, 2*W*Cout)
        # row (unmasked store); reduced over tiles / W-groups in JAX so the
        # row-tile grid axis stays "parallel".
        s = jnp.sum(acc, axis=0, keepdims=True)
        ss = jnp.sum(acc * acc, axis=0, keepdims=True)
        stats_ref[...] = jnp.concatenate([s, ss], axis=-1)

    return kernel


def _bn_lrelu_kernel(y_ref, scale_ref, shift_ref, o_ref):
    # y_ref/o_ref: (TR, W*C) lane-dense row tile; scale/shift: (1, W*C) folded.
    o_ref[...] = _leaky_relu(y_ref[...] * scale_ref[...] + shift_ref[...])


# ---------------------------------------------------------------------------
# Pallas-call wrappers
# ---------------------------------------------------------------------------
def conv3x3_folded(x_f, wm, b_f, H, prenorm=None):
    """x_f: (M, W*Cin) f32 lane-folded rows (M = N*H), wm: (3, W*Cin, W*Cout)
    bf16 band weights, b_f: (1, W*Cout) f32 folded bias.  prenorm: optional
    (scale_f, shift_f), each (1, W*Cin) f32, applied as LeakyReLU(x*s+t)
    before the conv.  Returns y_f (M, W*Cout) f32 and per-tile partial stats
    (num_tiles, 2*W*Cout)."""
    M, WCin = x_f.shape
    WCout = wm.shape[-1]
    apply_prenorm = prenorm is not None

    TM = _row_tile(M, H, 256)          # row tile, multiple of H (no halo leak)
    num_tiles = M // TM

    in_specs = [
        pl.BlockSpec((TM, WCin), lambda i: (i, 0)),
        pl.BlockSpec((3, WCin, WCout), lambda i: (0, 0, 0)),   # constant index
        pl.BlockSpec((1, WCout), lambda i: (0, 0)),
    ]
    args = [x_f, wm, b_f]
    if apply_prenorm:
        in_specs += [pl.BlockSpec((1, WCin), lambda i: (0, 0)),
                     pl.BlockSpec((1, WCin), lambda i: (0, 0))]
        args += [prenorm[0], prenorm[1]]

    y, stats = pl.pallas_call(
        _make_conv_kernel(apply_prenorm, H),
        out_shape=(
            jax.ShapeDtypeStruct((M, WCout), jnp.float32),
            jax.ShapeDtypeStruct((num_tiles, 2 * WCout), jnp.float32),
        ),
        grid=(num_tiles,),
        in_specs=in_specs,
        out_specs=[
            pl.BlockSpec((TM, WCout), lambda i: (i, 0)),
            pl.BlockSpec((1, 2 * WCout), lambda i: (i, 0)),
        ],
        compiler_params=pltpu.CompilerParams(
            dimension_semantics=("parallel",),
            vmem_limit_bytes=VMEM_LIMIT),
    )(*args)
    return y, stats


def bn_lrelu_folded(y_f, scale_f, shift_f):
    """Final-stage BN-normalize + LeakyReLU on lane-folded activations,
    streamed in row tiles (no whole-tensor VMEM residency)."""
    R, WC = y_f.shape
    TR = _row_tile(R, 8, 1024)
    return pl.pallas_call(
        _bn_lrelu_kernel,
        out_shape=jax.ShapeDtypeStruct((R, WC), jnp.float32),
        grid=(R // TR,),
        in_specs=[
            pl.BlockSpec((TR, WC), lambda i: (i, 0)),
            pl.BlockSpec((1, WC), lambda i: (0, 0)),
            pl.BlockSpec((1, WC), lambda i: (0, 0)),
        ],
        out_specs=pl.BlockSpec((TR, WC), lambda i: (i, 0)),
        compiler_params=pltpu.CompilerParams(
            dimension_semantics=("parallel",),
            vmem_limit_bytes=VMEM_LIMIT),
    )(y_f, scale_f, shift_f)


# ---------------------------------------------------------------------------
# Weight folding / BN statistics glue (plain JAX, trace-time small)
# ---------------------------------------------------------------------------
def build_band_weight(w, W):
    """w: (3,3,Cin,Cout) -> (3, W*Cin, W*Cout) band matrices for the
    lane-folded row conv.  wm[ky, wi*Cin+ci, wo*Cout+co] = w[ky, wi-wo+1, ci, co]
    when |wi-wo| <= 1 else 0 (the zeros implement W-dim zero padding)."""
    _, _, Cin, Cout = w.shape
    kx = jnp.arange(3)[:, None, None]
    wi = jnp.arange(W)[None, :, None]
    wo = jnp.arange(W)[None, None, :]
    ind = (wi == wo + kx - 1).astype(w.dtype)                # (3, W, W)
    m = jnp.einsum('yxio,xab->yaibo', w, ind)                # (3, W, Cin, W, Cout)
    return m.reshape(3, W * Cin, W * Cout)


def conv_bn_lrelu_stage(x_f, W_img, H_img, w, b, gamma, beta, prenorm=None):
    """Conv2d(3x3, pad=1) on lane-folded input; returns the *pre-BN* conv
    output plus this stage's folded BN+LeakyReLU (scale, shift) so it can be
    fused into the next conv kernel (or the final elementwise kernel)."""
    M = x_f.shape[0]
    Cout = w.shape[-1]
    wm = build_band_weight(w, W_img).astype(jnp.bfloat16)    # bf16 MXU operand
    b_f = jnp.tile(b, W_img)[None, :]

    y_f, stats = conv3x3_folded(x_f, wm, b_f, H_img, prenorm=prenorm)

    WCout = W_img * Cout
    s = stats[:, :WCout].sum(axis=0).reshape(W_img, Cout).sum(axis=0)
    ss = stats[:, WCout:].sum(axis=0).reshape(W_img, Cout).sum(axis=0)
    count = float(M * W_img)
    mean = s / count
    var = jnp.maximum(ss / count - mean * mean, 0.0)   # clamp: cancellation safety
    inv = gamma * jax.lax.rsqrt(var + BN_EPS)
    shift = beta - mean * inv
    scale_f = jnp.tile(inv, W_img)[None, :]
    shift_f = jnp.tile(shift, W_img)[None, :]
    return y_f, scale_f, shift_f


# ---------------------------------------------------------------------------
# Glue: bilinear upsample (align_corners=True) as interpolation matmuls,
# channel concat, NCHW wrapper
# ---------------------------------------------------------------------------
def _interp_matrix(n_out, n_in):
    """align_corners=True linear-interp matrix (n_out, n_in)."""
    if n_in == 1:
        return jnp.ones((n_out, 1), jnp.float32)
    pos = (jnp.linspace(0.0, n_in - 1.0, n_out) if n_out > 1
           else jnp.zeros((n_out,), jnp.float32))
    lo = jnp.clip(jnp.floor(pos).astype(jnp.int32), 0, n_in - 2)
    hi = lo + 1
    frac = pos - lo.astype(jnp.float32)
    rows = jnp.arange(n_out)
    m = jnp.zeros((n_out, n_in), jnp.float32)
    m = m.at[rows, lo].add(1.0 - frac)
    m = m.at[rows, hi].add(frac)
    return m


def _upsample_concat(x_nchw, concat_nchw):
    """NCHW -> NHWC, matmul-form bilinear upsample to the skip resolution,
    channel concat.  Returns (N, Ho, Wo, Cin) NHWC."""
    x = jnp.transpose(x_nchw, (0, 2, 3, 1))
    c = jnp.transpose(concat_nchw, (0, 2, 3, 1))
    Ho, Wo = c.shape[1], c.shape[2]
    Rm = _interp_matrix(Ho, x.shape[1])
    Cm = _interp_matrix(Wo, x.shape[2])
    up = jnp.einsum('hH,nHWc,wW->nhwc', Rm, x, Cm)
    return jnp.concatenate([up, c], axis=-1)


def upsample_bn_forward(x_nchw, concat_nchw, params):
    N = concat_nchw.shape[0]
    Ho, Wo = concat_nchw.shape[2], concat_nchw.shape[3]
    f = _upsample_concat(x_nchw, concat_nchw)      # (N, Ho, Wo, Cin)
    Cin = f.shape[-1]
    f_f = f.reshape(N * Ho, Wo * Cin)              # lane-fold, batch into M

    # Stage 1: conv only — its BN + LeakyReLU is fused into stage 2's kernel.
    y1_f, sc1, sh1 = conv_bn_lrelu_stage(
        f_f, Wo, Ho, params["w1"], params["b1"], params["g1"], params["be1"])
    # Stage 2: fused [BN1+LReLU1] -> conv2; its own BN+LReLU applied below.
    y2_f, sc2, sh2 = conv_bn_lrelu_stage(
        y1_f, Wo, Ho, params["w2"], params["b2"], params["g2"], params["be2"],
        prenorm=(sc1, sh1))
    out_f = bn_lrelu_folded(y2_f, sc2, sh2)        # (N*Ho, Wo*Cout)

    Cout = params["w2"].shape[-1]
    out = out_f.reshape(N, Ho, Wo, Cout)
    return jnp.transpose(out, (0, 3, 1, 2))        # NHWC -> NCHW


# ---------------------------------------------------------------------------
# Pure-JAX reference (same bf16 matmul operands, f32 accumulate) for parity
# ---------------------------------------------------------------------------
def _conv_bn_lrelu_ref(z, w, b, g, be):
    y = jax.lax.conv_general_dilated(
        z.astype(jnp.bfloat16), w.astype(jnp.bfloat16),
        window_strides=(1, 1), padding='SAME',
        dimension_numbers=('NHWC', 'HWIO', 'NHWC'),
        preferred_element_type=jnp.float32) + b
    mean = y.mean(axis=(0, 1, 2))
    var = y.var(axis=(0, 1, 2))                    # biased, like torch BN train
    yn = (y - mean) * jax.lax.rsqrt(var + BN_EPS) * g + be
    return jnp.where(yn >= 0, yn, NEG_SLOPE * yn)


def reference_forward(x_nchw, concat_nchw, params):
    f = _upsample_concat(x_nchw, concat_nchw)
    y1 = _conv_bn_lrelu_ref(f, params["w1"], params["b1"], params["g1"], params["be1"])
    y2 = _conv_bn_lrelu_ref(y1, params["w2"], params["b2"], params["g2"], params["be2"])
    return jnp.transpose(y2, (0, 3, 1, 2))


# ---------------------------------------------------------------------------
def init_params(key, skip_input, output_features):
    k1, k2, k3, k4 = jax.random.split(key, 4)

    def conv_w(k, cin, cout):
        bound = 1.0 / (cin * 9) ** 0.5             # PyTorch default uniform init
        return jax.random.uniform(k, (3, 3, cin, cout), jnp.float32, -bound, bound)

    def conv_b(k, cin, cout):
        bound = 1.0 / (cin * 9) ** 0.5
        return jax.random.uniform(k, (cout,), jnp.float32, -bound, bound)

    return {
        "w1": conv_w(k1, skip_input, output_features),
        "b1": conv_b(k2, skip_input, output_features),
        "g1": jnp.ones((output_features,), jnp.float32),
        "be1": jnp.zeros((output_features,), jnp.float32),
        "w2": conv_w(k3, output_features, output_features),
        "b2": conv_b(k4, output_features, output_features),
        "g2": jnp.ones((output_features,), jnp.float32),
        "be2": jnp.zeros((output_features,), jnp.float32),
    }


if __name__ == "__main__":
    key = jax.random.PRNGKey(0)
    kx, kc, kp = jax.random.split(key, 3)

    # small shapes: x is the low-res feature map, concat_with the skip feature
    x = jax.random.normal(kx, (2, 4, 8, 8), jnp.float32)              # NCHW
    concat_with = jax.random.normal(kc, (2, 4, 16, 16), jnp.float32)  # NCHW

    skip_input = x.shape[1] + concat_with.shape[1]   # 8
    output_features = 8                              # -> W*C = 16*8 = 128 lanes
    params = init_params(kp, skip_input, output_features)

    fwd = jax.jit(upsample_bn_forward)
    out = jax.block_until_ready(fwd(x, concat_with, params))
    assert out.shape == (2, output_features, 16, 16), out.shape

    ref = jax.block_until_ready(jax.jit(reference_forward)(x, concat_with, params))
    max_err = float(jnp.max(jnp.abs(out - ref)))
    assert jnp.allclose(out, ref, atol=2e-2, rtol=2e-2), max_err

    print("KERNEL_OK")
</pallas_src>

<mosaic_0001>
module attributes {stable_mosaic.version = 11 : i64} {
  func.func @kernel(%arg0: i32, %arg1: memref<32x128xf32, #tpu.memory_space<vmem>>, %arg2: memref<3x128x128xbf16, #tpu.memory_space<vmem>>, %arg3: memref<1x128xf32, #tpu.memory_space<vmem>>, %arg4: memref<32x128xf32, #tpu.memory_space<vmem>>, %arg5: memref<1x256xf32, #tpu.memory_space<vmem>>) attributes {dimension_semantics = [#tpu.dimension_semantics<parallel>], iteration_bounds = array<i64: 1>, scalar_prefetch = 0 : i64, scratch_operands = 0 : i64, tpu.core_type = #tpu.core_type<tc>, window_params = [{transform_indices = @transform_0, window_bounds = array<i64: 32, 128>}, {pipeline_mode = #tpu.pipeline_mode<synchronous>, transform_indices = @transform_1, window_bounds = array<i64: 3, 128, 128>}, {pipeline_mode = #tpu.pipeline_mode<synchronous>, transform_indices = @transform_2, window_bounds = array<i64: 1, 128>}, {transform_indices = @transform_3, window_bounds = array<i64: 32, 128>}, {transform_indices = @transform_4, window_bounds = array<i64: 1, 256>}]} {
    %c0 = arith.constant 0 : index
    %c0_0 = arith.constant 0 : index
    %0 = vector.load %arg1[%c0, %c0_0] : memref<32x128xf32, #tpu.memory_space<vmem>>, vector<32x128xf32>
    %1 = arith.truncf %0 : vector<32x128xf32> to vector<32x128xbf16>
    %2 = tpu.iota {dimensions = array<i32: 0>} : vector<32x1xi32>
    %c16_i32 = arith.constant 16 : i32
    %c0_i32 = arith.constant 0 : i32
    %3 = arith.cmpi eq, %c16_i32, %c0_i32 : i32
    %c1_i32 = arith.constant 1 : i32
    %4 = arith.select %3, %c1_i32, %c16_i32 : i32
    %5 = vector.broadcast %4 : i32 to vector<32x1xi32>
    %6 = arith.remsi %2, %5 : vector<32x1xi32>
    %c0_i32_1 = arith.constant 0 : i32
    %7 = vector.broadcast %c0_i32_1 : i32 to vector<32x1xi32>
    %8 = arith.cmpi ne, %6, %7 : vector<32x1xi32>
    %c0_i32_2 = arith.constant 0 : i32
    %9 = vector.broadcast %c0_i32_2 : i32 to vector<32x1xi32>
    %10 = arith.cmpi slt, %6, %9 : vector<32x1xi32>
    %c0_i32_3 = arith.constant 0 : i32
    %11 = arith.cmpi slt, %4, %c0_i32_3 : i32
    %12 = vector.broadcast %11 : i1 to vector<32x1xi1>
    %13 = vector.broadcast %12 : vector<32x1xi1> to vector<32x1xi1>
    %14 = arith.xori %10, %13 : vector<32x1xi1>
    %15 = arith.andi %14, %8 : vector<32x1xi1>
    %16 = vector.broadcast %4 : i32 to vector<32x1xi32>
    %17 = arith.addi %6, %16 : vector<32x1xi32>
    %18 = arith.select %15, %17, %6 : vector<32x1xi1>, vector<32x1xi32>
    %cst = arith.constant 0.000000e+00 : bf16
    %19 = vector.broadcast %cst : bf16 to vector<1x128xbf16>
    %20 = vector.extract_strided_slice %1 {offsets = [0, 0], sizes = [31, 128], strides = [1, 1]} : vector<32x128xbf16> to vector<31x128xbf16>
    %21 = tpu.concatenate %19, %20 in 0 : vector<1x128xbf16>, vector<31x128xbf16> -> vector<32x128xbf16>
    %22 = vector.extract_strided_slice %1 {offsets = [1, 0], sizes = [31, 128], strides = [1, 1]} : vector<32x128xbf16> to vector<31x128xbf16>
    %23 = tpu.concatenate %22, %19 in 0 : vector<31x128xbf16>, vector<1x128xbf16> -> vector<32x128xbf16>
    %c0_i32_4 = arith.constant 0 : i32
    %24 = vector.broadcast %c0_i32_4 : i32 to vector<32x1xi32>
    %25 = arith.cmpi eq, %18, %24 : vector<32x1xi32>
    %cst_5 = arith.constant 0.000000e+00 : f32
    %26 = arith.truncf %cst_5 : f32 to bf16
    %27 = vector.shape_cast %25 : vector<32x1xi1> to vector<32x1xi1>
    %28 = vector.broadcast %27 : vector<32x1xi1> to vector<32x128xi1>
    %29 = vector.broadcast %26 : bf16 to vector<32x128xbf16>
    %30 = arith.select %28, %29, %21 : vector<32x128xi1>, vector<32x128xbf16>
    %c15_i32 = arith.constant 15 : i32
    %31 = vector.broadcast %c15_i32 : i32 to vector<32x1xi32>
    %32 = arith.cmpi eq, %18, %31 : vector<32x1xi32>
    %cst_6 = arith.constant 0.000000e+00 : f32
    %33 = arith.truncf %cst_6 : f32 to bf16
    %34 = vector.shape_cast %32 : vector<32x1xi1> to vector<32x1xi1>
    %35 = vector.broadcast %34 : vector<32x1xi1> to vector<32x128xi1>
    %36 = vector.broadcast %33 : bf16 to vector<32x128xbf16>
    %37 = arith.select %35, %36, %23 : vector<32x128xi1>, vector<32x128xbf16>
    %c0_7 = arith.constant 0 : index
    %c0_8 = arith.constant 0 : index
    %c0_9 = arith.constant 0 : index
    %38 = vector.load %arg2[%c0_7, %c0_8, %c0_9] : memref<3x128x128xbf16, #tpu.memory_space<vmem>>, vector<1x128x128xbf16>
    %39 = vector.shape_cast %38 : vector<1x128x128xbf16> to vector<128x128xbf16>
    %cst_10 = arith.constant dense<0.000000e+00> : vector<32x128xf32>
    %40 = tpu.matmul %30, %39, %cst_10 {dimension_numbers = #tpu.dot_dimension_numbers<[1], [0], [0], [1], [0, 0, 1, 1], [], []>} : vector<32x128xbf16>, vector<128x128xbf16>, vector<32x128xf32> -> vector<32x128xf32>
    %c1 = arith.constant 1 : index
    %c0_11 = arith.constant 0 : index
    %c0_12 = arith.constant 0 : index
    %41 = vector.load %arg2[%c1, %c0_11, %c0_12] : memref<3x128x128xbf16, #tpu.memory_space<vmem>>, vector<1x128x128xbf16>
    %42 = vector.shape_cast %41 : vector<1x128x128xbf16> to vector<128x128xbf16>
    %cst_13 = arith.constant dense<0.000000e+00> : vector<32x128xf32>
    %43 = tpu.matmul %1, %42, %cst_13 {dimension_numbers = #tpu.dot_dimension_numbers<[1], [0], [0], [1], [0, 0, 1, 1], [], []>} : vector<32x128xbf16>, vector<128x128xbf16>, vector<32x128xf32> -> vector<32x128xf32>
    %44 = arith.addf %40, %43 : vector<32x128xf32>
    %c2 = arith.constant 2 : index
    %c0_14 = arith.constant 0 : index
    %c0_15 = arith.constant 0 : index
    %45 = vector.load %arg2[%c2, %c0_14, %c0_15] : memref<3x128x128xbf16, #tpu.memory_space<vmem>>, vector<1x128x128xbf16>
    %46 = vector.shape_cast %45 : vector<1x128x128xbf16> to vector<128x128xbf16>
    %cst_16 = arith.constant dense<0.000000e+00> : vector<32x128xf32>
    %47 = tpu.matmul %37, %46, %cst_16 {dimension_numbers = #tpu.dot_dimension_numbers<[1], [0], [0], [1], [0, 0, 1, 1], [], []>} : vector<32x128xbf16>, vector<128x128xbf16>, vector<32x128xf32> -> vector<32x128xf32>
    %48 = arith.addf %44, %47 : vector<32x128xf32>
    %c0_17 = arith.constant 0 : index
    %c0_18 = arith.constant 0 : index
    %49 = vector.load %arg3[%c0_17, %c0_18] : memref<1x128xf32, #tpu.memory_space<vmem>>, vector<1x128xf32>
    %50 = vector.broadcast %49 : vector<1x128xf32> to vector<32x128xf32>
    %51 = arith.addf %48, %50 : vector<32x128xf32>
    %c0_19 = arith.constant 0 : index
    %c0_20 = arith.constant 0 : index
    %52 = vector.load %arg4[%c0_19, %c0_20] : memref<32x128xf32, #tpu.memory_space<vmem>>, vector<32x128xf32>
    tpu.vector_store %arg4[%c0_19, %c0_20], %51 {strides = array<i32>} : memref<32x128xf32, #tpu.memory_space<vmem>>, vector<32x128xf32>,
    %cst_21 = arith.constant dense<0.000000e+00> : vector<128xf32>
    %53 = vector.multi_reduction <add>, %51, %cst_21 [0] : vector<32x128xf32> to vector<128xf32>
    %54 = vector.shape_cast %53 : vector<128xf32> to vector<1x128xf32>
    %55 = arith.mulf %51, %51 : vector<32x128xf32>
    %cst_22 = arith.constant dense<0.000000e+00> : vector<128xf32>
    %56 = vector.multi_reduction <add>, %55, %cst_22 [0] : vector<32x128xf32> to vector<128xf32>
    %57 = vector.shape_cast %56 : vector<128xf32> to vector<1x128xf32>
    %58 = tpu.concatenate %54, %57 in 1 : vector<1x128xf32>, vector<1x128xf32> -> vector<1x256xf32>
    %c0_23 = arith.constant 0 : index
    %c0_24 = arith.constant 0 : index
    %59 = vector.load %arg5[%c0_23, %c0_24] : memref<1x256xf32, #tpu.memory_space<vmem>>, vector<1x256xf32>
    tpu.vector_store %arg5[%c0_23, %c0_24], %58 {strides = array<i32>} : memref<1x256xf32, #tpu.memory_space<vmem>>, vector<1x256xf32>,
    return
  }
  func.func @transform_0(%arg0: i32) -> (i32, i32) {
    %c0_i32 = arith.constant 0 : i32
    %c0_i32_0 = arith.constant 0 : i32
    return %arg0, %c0_i32 : i32, i32
  }
  func.func @transform_1(%arg0: i32) -> (i32, i32, i32) {
    %c0_i32 = arith.constant 0 : i32
    %c0_i32_0 = arith.constant 0 : i32
    %c0_i32_1 = arith.constant 0 : i32
    %c0_i32_2 = arith.constant 0 : i32
    return %c0_i32, %c0_i32_0, %c0_i32_1 : i32, i32, i32
  }
  func.func @transform_2(%arg0: i32) -> (i32, i32) {
    %c0_i32 = arith.constant 0 : i32
    %c0_i32_0 = arith.constant 0 : i32
    %c0_i32_1 = arith.constant 0 : i32
    return %c0_i32, %c0_i32_0 : i32, i32
  }
  func.func @transform_3(%arg0: i32) -> (i32, i32) {
    %c0_i32 = arith.constant 0 : i32
    %c0_i32_0 = arith.constant 0 : i32
    return %arg0, %c0_i32 : i32, i32
  }
  func.func @transform_4(%arg0: i32) -> (i32, i32) {
    %c0_i32 = arith.constant 0 : i32
    %c0_i32_0 = arith.constant 0 : i32
    return %arg0, %c0_i32 : i32, i32
  }
}

module attributes {stable_mosaic.version = 11 : i64} {
  func.func @kernel(%arg0: i32, %arg1: memref<32x128xf32, #tpu.memory_space<vmem>>, %arg2: memref<3x128x128xbf16, #tpu.memory_space<vmem>>, %arg3: memref<1x128xf32, #tpu.memory_space<vmem>>, %arg4: memref<1x128xf32, #tpu.memory_space<vmem>>, %arg5: memref<1x128xf32, #tpu.memory_space<vmem>>, %arg6: memref<32x128xf32, #tpu.memory_space<vmem>>, %arg7: memref<1x256xf32, #tpu.memory_space<vmem>>) attributes {dimension_semantics = [#tpu.dimension_semantics<parallel>], iteration_bounds = array<i64: 1>, scalar_prefetch = 0 : i64, scratch_operands = 0 : i64, tpu.core_type = #tpu.core_type<tc>, window_params = [{transform_indices = @transform_0, window_bounds = array<i64: 32, 128>}, {pipeline_mode = #tpu.pipeline_mode<synchronous>, transform_indices = @transform_1, window_bounds = array<i64: 3, 128, 128>}, {pipeline_mode = #tpu.pipeline_mode<synchronous>, transform_indices = @transform_2, window_bounds = array<i64: 1, 128>}, {pipeline_mode = #tpu.pipeline_mode<synchronous>, transform_indices = @transform_3, window_bounds = array<i64: 1, 128>}, {pipeline_mode = #tpu.pipeline_mode<synchronous>, transform_indices = @transform_4, window_bounds = array<i64: 1, 128>}, {transform_indices = @transform_5, window_bounds = array<i64: 32, 128>}, {transform_indices = @transform_6, window_bounds = array<i64: 1, 256>}]} {
    %c0 = arith.constant 0 : index
    %c0_0 = arith.constant 0 : index
    %0 = vector.load %arg1[%c0, %c0_0] : memref<32x128xf32, #tpu.memory_space<vmem>>, vector<32x128xf32>
    %c0_1 = arith.constant 0 : index
    %c0_2 = arith.constant 0 : index
    %1 = vector.load %arg4[%c0_1, %c0_2] : memref<1x128xf32, #tpu.memory_space<vmem>>, vector<1x128xf32>
    %2 = vector.broadcast %1 : vector<1x128xf32> to vector<32x128xf32>
    %3 = arith.mulf %0, %2 : vector<32x128xf32>
    %c0_3 = arith.constant 0 : index
    %c0_4 = arith.constant 0 : index
    %4 = vector.load %arg5[%c0_3, %c0_4] : memref<1x128xf32, #tpu.memory_space<vmem>>, vector<1x128xf32>
    %5 = vector.broadcast %4 : vector<1x128xf32> to vector<32x128xf32>
    %6 = arith.addf %3, %5 : vector<32x128xf32>
    %cst = arith.constant 0.000000e+00 : f32
    %7 = vector.broadcast %cst : f32 to vector<32x128xf32>
    %8 = arith.cmpf oge, %6, %7 : vector<32x128xf32>
    %cst_5 = arith.constant 0.00999999977 : f32
    %9 = vector.broadcast %cst_5 : f32 to vector<32x128xf32>
    %10 = arith.mulf %9, %6 : vector<32x128xf32>
    %11 = arith.select %8, %6, %10 : vector<32x128xi1>, vector<32x128xf32>
    %12 = arith.truncf %11 : vector<32x128xf32> to vector<32x128xbf16>
    %13 = tpu.iota {dimensions = array<i32: 0>} : vector<32x1xi32>
    %c16_i32 = arith.constant 16 : i32
    %c0_i32 = arith.constant 0 : i32
    %14 = arith.cmpi eq, %c16_i32, %c0_i32 : i32
    %c1_i32 = arith.constant 1 : i32
    %15 = arith.select %14, %c1_i32, %c16_i32 : i32
    %16 = vector.broadcast %15 : i32 to vector<32x1xi32>
    %17 = arith.remsi %13, %16 : vector<32x1xi32>
    %c0_i32_6 = arith.constant 0 : i32
    %18 = vector.broadcast %c0_i32_6 : i32 to vector<32x1xi32>
    %19 = arith.cmpi ne, %17, %18 : vector<32x1xi32>
    %c0_i32_7 = arith.constant 0 : i32
    %20 = vector.broadcast %c0_i32_7 : i32 to vector<32x1xi32>
    %21 = arith.cmpi slt, %17, %20 : vector<32x1xi32>
    %c0_i32_8 = arith.constant 0 : i32
    %22 = arith.cmpi slt, %15, %c0_i32_8 : i32
    %23 = vector.broadcast %22 : i1 to vector<32x1xi1>
    %24 = vector.broadcast %23 : vector<32x1xi1> to vector<32x1xi1>
    %25 = arith.xori %21, %24 : vector<32x1xi1>
    %26 = arith.andi %25, %19 : vector<32x1xi1>
    %27 = vector.broadcast %15 : i32 to vector<32x1xi32>
    %28 = arith.addi %17, %27 : vector<32x1xi32>
    %29 = arith.select %26, %28, %17 : vector<32x1xi1>, vector<32x1xi32>
    %cst_9 = arith.constant 0.000000e+00 : bf16
    %30 = vector.broadcast %cst_9 : bf16 to vector<1x128xbf16>
    %31 = vector.extract_strided_slice %12 {offsets = [0, 0], sizes = [31, 128], strides = [1, 1]} : vector<32x128xbf16> to vector<31x128xbf16>
    %32 = tpu.concatenate %30, %31 in 0 : vector<1x128xbf16>, vector<31x128xbf16> -> vector<32x128xbf16>
    %33 = vector.extract_strided_slice %12 {offsets = [1, 0], sizes = [31, 128], strides = [1, 1]} : vector<32x128xbf16> to vector<31x128xbf16>
    %34 = tpu.concatenate %33, %30 in 0 : vector<31x128xbf16>, vector<1x128xbf16> -> vector<32x128xbf16>
    %c0_i32_10 = arith.constant 0 : i32
    %35 = vector.broadcast %c0_i32_10 : i32 to vector<32x1xi32>
    %36 = arith.cmpi eq, %29, %35 : vector<32x1xi32>
    %cst_11 = arith.constant 0.000000e+00 : f32
    %37 = arith.truncf %cst_11 : f32 to bf16
    %38 = vector.shape_cast %36 : vector<32x1xi1> to vector<32x1xi1>
    %39 = vector.broadcast %38 : vector<32x1xi1> to vector<32x128xi1>
    %40 = vector.broadcast %37 : bf16 to vector<32x128xbf16>
    %41 = arith.select %39, %40, %32 : vector<32x128xi1>, vector<32x128xbf16>
    %c15_i32 = arith.constant 15 : i32
    %42 = vector.broadcast %c15_i32 : i32 to vector<32x1xi32>
    %43 = arith.cmpi eq, %29, %42 : vector<32x1xi32>
    %cst_12 = arith.constant 0.000000e+00 : f32
    %44 = arith.truncf %cst_12 : f32 to bf16
    %45 = vector.shape_cast %43 : vector<32x1xi1> to vector<32x1xi1>
    %46 = vector.broadcast %45 : vector<32x1xi1> to vector<32x128xi1>
    %47 = vector.broadcast %44 : bf16 to vector<32x128xbf16>
    %48 = arith.select %46, %47, %34 : vector<32x128xi1>, vector<32x128xbf16>
    %c0_13 = arith.constant 0 : index
    %c0_14 = arith.constant 0 : index
    %c0_15 = arith.constant 0 : index
    %49 = vector.load %arg2[%c0_13, %c0_14, %c0_15] : memref<3x128x128xbf16, #tpu.memory_space<vmem>>, vector<1x128x128xbf16>
    %50 = vector.shape_cast %49 : vector<1x128x128xbf16> to vector<128x128xbf16>
    %cst_16 = arith.constant dense<0.000000e+00> : vector<32x128xf32>
    %51 = tpu.matmul %41, %50, %cst_16 {dimension_numbers = #tpu.dot_dimension_numbers<[1], [0], [0], [1], [0, 0, 1, 1], [], []>} : vector<32x128xbf16>, vector<128x128xbf16>, vector<32x128xf32> -> vector<32x128xf32>
    %c1 = arith.constant 1 : index
    %c0_17 = arith.constant 0 : index
    %c0_18 = arith.constant 0 : index
    %52 = vector.load %arg2[%c1, %c0_17, %c0_18] : memref<3x128x128xbf16, #tpu.memory_space<vmem>>, vector<1x128x128xbf16>
    %53 = vector.shape_cast %52 : vector<1x128x128xbf16> to vector<128x128xbf16>
    %cst_19 = arith.constant dense<0.000000e+00> : vector<32x128xf32>
    %54 = tpu.matmul %12, %53, %cst_19 {dimension_numbers = #tpu.dot_dimension_numbers<[1], [0], [0], [1], [0, 0, 1, 1], [], []>} : vector<32x128xbf16>, vector<128x128xbf16>, vector<32x128xf32> -> vector<32x128xf32>
    %55 = arith.addf %51, %54 : vector<32x128xf32>
    %c2 = arith.constant 2 : index
    %c0_20 = arith.constant 0 : index
    %c0_21 = arith.constant 0 : index
    %56 = vector.load %arg2[%c2, %c0_20, %c0_21] : memref<3x128x128xbf16, #tpu.memory_space<vmem>>, vector<1x128x128xbf16>
    %57 = vector.shape_cast %56 : vector<1x128x128xbf16> to vector<128x128xbf16>
    %cst_22 = arith.constant dense<0.000000e+00> : vector<32x128xf32>
    %58 = tpu.matmul %48, %57, %cst_22 {dimension_numbers = #tpu.dot_dimension_numbers<[1], [0], [0], [1], [0, 0, 1, 1], [], []>} : vector<32x128xbf16>, vector<128x128xbf16>, vector<32x128xf32> -> vector<32x128xf32>
    %59 = arith.addf %55, %58 : vector<32x128xf32>
    %c0_23 = arith.constant 0 : index
    %c0_24 = arith.constant 0 : index
    %60 = vector.load %arg3[%c0_23, %c0_24] : memref<1x128xf32, #tpu.memory_space<vmem>>, vector<1x128xf32>
    %61 = vector.broadcast %60 : vector<1x128xf32> to vector<32x128xf32>
    %62 = arith.addf %59, %61 : vector<32x128xf32>
    %c0_25 = arith.constant 0 : index
    %c0_26 = arith.constant 0 : index
    %63 = vector.load %arg6[%c0_25, %c0_26] : memref<32x128xf32, #tpu.memory_space<vmem>>, vector<32x128xf32>
    tpu.vector_store %arg6[%c0_25, %c0_26], %62 {strides = array<i32>} : memref<32x128xf32, #tpu.memory_space<vmem>>, vector<32x128xf32>,
    %cst_27 = arith.constant dense<0.000000e+00> : vector<128xf32>
    %64 = vector.multi_reduction <add>, %62, %cst_27 [0] : vector<32x128xf32> to vector<128xf32>
    %65 = vector.shape_cast %64 : vector<128xf32> to vector<1x128xf32>
    %66 = arith.mulf %62, %62 : vector<32x128xf32>
    %cst_28 = arith.constant dense<0.000000e+00> : vector<128xf32>
    %67 = vector.multi_reduction <add>, %66, %cst_28 [0] : vector<32x128xf32> to vector<128xf32>
    %68 = vector.shape_cast %67 : vector<128xf32> to vector<1x128xf32>
    %69 = tpu.concatenate %65, %68 in 1 : vector<1x128xf32>, vector<1x128xf32> -> vector<1x256xf32>
    %c0_29 = arith.constant 0 : index
    %c0_30 = arith.constant 0 : index
    %70 = vector.load %arg7[%c0_29, %c0_30] : memref<1x256xf32, #tpu.memory_space<vmem>>, vector<1x256xf32>
    tpu.vector_store %arg7[%c0_29, %c0_30], %69 {strides = array<i32>} : memref<1x256xf32, #tpu.memory_space<vmem>>, vector<1x256xf32>,
    return
  }
  func.func @transform_0(%arg0: i32) -> (i32, i32) {
    %c0_i32 = arith.constant 0 : i32
    %c0_i32_0 = arith.constant 0 : i32
    return %arg0, %c0_i32 : i32, i32
  }
  func.func @transform_1(%arg0: i32) -> (i32, i32, i32) {
    %c0_i32 = arith.constant 0 : i32
    %c0_i32_0 = arith.constant 0 : i32
    %c0_i32_1 = arith.constant 0 : i32
    %c0_i32_2 = arith.constant 0 : i32
    return %c0_i32, %c0_i32_0, %c0_i32_1 : i32, i32, i32
  }
  func.func @transform_2(%arg0: i32) -> (i32, i32) {
    %c0_i32 = arith.constant 0 : i32
    %c0_i32_0 = arith.constant 0 : i32
    %c0_i32_1 = arith.constant 0 : i32
    return %c0_i32, %c0_i32_0 : i32, i32
  }
  func.func @transform_3(%arg0: i32) -> (i32, i32) {
    %c0_i32 = arith.constant 0 : i32
    %c0_i32_0 = arith.constant 0 : i32
    %c0_i32_1 = arith.constant 0 : i32
    return %c0_i32, %c0_i32_0 : i32, i32
  }
  func.func @transform_4(%arg0: i32) -> (i32, i32) {
    %c0_i32 = arith.constant 0 : i32
    %c0_i32_0 = arith.constant 0 : i32
    %c0_i32_1 = arith.constant 0 : i32
    return %c0_i32, %c0_i32_0 : i32, i32
  }
  func.func @transform_5(%arg0: i32) -> (i32, i32) {
    %c0_i32 = arith.constant 0 : i32
    %c0_i32_0 = arith.constant 0 : i32
    return %arg0, %c0_i32 : i32, i32
  }
  func.func @transform_6(%arg0: i32) -> (i32, i32) {
    %c0_i32 = arith.constant 0 : i32
    %c0_i32_0 = arith.constant 0 : i32
    return %arg0, %c0_i32 : i32, i32
  }
}

module attributes {stable_mosaic.version = 11 : i64} {
  func.func @_bn_lrelu_kernel(%arg0: i32, %arg1: memref<32x128xf32, #tpu.memory_space<vmem>>, %arg2: memref<1x128xf32, #tpu.memory_space<vmem>>, %arg3: memref<1x128xf32, #tpu.memory_space<vmem>>, %arg4: memref<32x128xf32, #tpu.memory_space<vmem>>) attributes {dimension_semantics = [#tpu.dimension_semantics<parallel>], iteration_bounds = array<i64: 1>, scalar_prefetch = 0 : i64, scratch_operands = 0 : i64, tpu.core_type = #tpu.core_type<tc>, window_params = [{transform_indices = @transform_0, window_bounds = array<i64: 32, 128>}, {pipeline_mode = #tpu.pipeline_mode<synchronous>, transform_indices = @transform_1, window_bounds = array<i64: 1, 128>}, {pipeline_mode = #tpu.pipeline_mode<synchronous>, transform_indices = @transform_2, window_bounds = array<i64: 1, 128>}, {transform_indices = @transform_3, window_bounds = array<i64: 32, 128>}]} {
    %c0 = arith.constant 0 : index
    %c0_0 = arith.constant 0 : index
    %0 = vector.load %arg1[%c0, %c0_0] : memref<32x128xf32, #tpu.memory_space<vmem>>, vector<32x128xf32>
    %c0_1 = arith.constant 0 : index
    %c0_2 = arith.constant 0 : index
    %1 = vector.load %arg2[%c0_1, %c0_2] : memref<1x128xf32, #tpu.memory_space<vmem>>, vector<1x128xf32>
    %2 = vector.broadcast %1 : vector<1x128xf32> to vector<32x128xf32>
    %3 = arith.mulf %0, %2 : vector<32x128xf32>
    %c0_3 = arith.constant 0 : index
    %c0_4 = arith.constant 0 : index
    %4 = vector.load %arg3[%c0_3, %c0_4] : memref<1x128xf32, #tpu.memory_space<vmem>>, vector<1x128xf32>
    %5 = vector.broadcast %4 : vector<1x128xf32> to vector<32x128xf32>
    %6 = arith.addf %3, %5 : vector<32x128xf32>
    %cst = arith.constant 0.000000e+00 : f32
    %7 = vector.broadcast %cst : f32 to vector<32x128xf32>
    %8 = arith.cmpf oge, %6, %7 : vector<32x128xf32>
    %cst_5 = arith.constant 0.00999999977 : f32
    %9 = vector.broadcast %cst_5 : f32 to vector<32x128xf32>
    %10 = arith.mulf %9, %6 : vector<32x128xf32>
    %11 = arith.select %8, %6, %10 : vector<32x128xi1>, vector<32x128xf32>
    %c0_6 = arith.constant 0 : index
    %c0_7 = arith.constant 0 : index
    %12 = vector.load %arg4[%c0_6, %c0_7] : memref<32x128xf32, #tpu.memory_space<vmem>>, vector<32x128xf32>
    tpu.vector_store %arg4[%c0_6, %c0_7], %11 {strides = array<i32>} : memref<32x128xf32, #tpu.memory_space<vmem>>, vector<32x128xf32>,
    return
  }
  func.func @transform_0(%arg0: i32) -> (i32, i32) {
    %c0_i32 = arith.constant 0 : i32
    %c0_i32_0 = arith.constant 0 : i32
    return %arg0, %c0_i32 : i32, i32
  }
  func.func @transform_1(%arg0: i32) -> (i32, i32) {
    %c0_i32 = arith.constant 0 : i32
    %c0_i32_0 = arith.constant 0 : i32
    %c0_i32_1 = arith.constant 0 : i32
    return %c0_i32, %c0_i32_0 : i32, i32
  }
  func.func @transform_2(%arg0: i32) -> (i32, i32) {
    %c0_i32 = arith.constant 0 : i32
    %c0_i32_0 = arith.constant 0 : i32
    %c0_i32_1 = arith.constant 0 : i32
    return %c0_i32, %c0_i32_0 : i32, i32
  }
  func.func @transform_3(%arg0: i32) -> (i32, i32) {
    %c0_i32 = arith.constant 0 : i32
    %c0_i32_0 = arith.constant 0 : i32
    return %arg0, %c0_i32 : i32, i32
  }
}

</mosaic_0001>

<bundles_post_ra>
// kernel: tile.33
= control target key start
LH: loop header
LB: loop body
LE: loop exit
PB: predicated region body
PF: predicated region fallthrough
CT: control target
= control target key end

     0   :  { %s28_s0 = inlined_call_operand.vmem [shape: f32[8], index: 0, kind: input, shape index: {}]   ;;  %s29_s1 = inlined_call_operand.vmem [shape: f32[16,8], index: 1, kind: output, shape index: {}]  }
   0x1   :  { %v4_v0 = vld [vmem:[%s28_s0] ss:$0 sm:$0xff] }
   0x2   :  { %5 = vst [vmem:[%s29_s1] sm:$0xff] %v4_v0 }
   0x3   :  { %8 = vst [vmem:[%s29_s1 + $0x8] sm:$0xff] %v4_v0 }

// kernel: tile.34
= control target key start
LH: loop header
LB: loop body
LE: loop exit
PB: predicated region body
PF: predicated region fallthrough
CT: control target
= control target key end

     0   :  { %s131_s10 = smov 120   ;;  %s132_s11 = smov 104   ;;  %vm3_vm0 = vcmask 64512   ;;  %vm9_vm1 = vcmask 1048512   ;;  %vm15_vm2 = vcmask 982912   ;;  %vm21_vm3 = vcmask 917312   ;;  %s207_s0 = inlined_call_operand.vmem [shape: f32[16,8], index: 0, kind: input, shape index: {}]   ;;  %s208_s1 = inlined_call_operand.vmem [shape: f32[1,128], index: 1, kind: output, shape index: {}]  }
   0x1   :  { %v101_v0 = vld [vmem:[%s207_s0 + $0xf] sm:$0x1]   ;;  %v103_v1 = vld [vmem:[%s207_s0 + $0xd] sm:$0x1]   ;;  %v105_v2 = vld [vmem:[%s207_s0 + $0xb] sm:$0x1]  }
   0x2   :  { %7 = vrot.lane.b32.xlu0 %v101_v0, %s131_s10  ;;  %19 = vrot.lane.b32.xlu1 %v103_v1, %s132_s11  ;;  %s133_s14 = smov 88   ;;  %v102_v3 = vld [vmem:[%s207_s0 + $0xe] sm:$0x1]   ;;  %v104_v4 = vld [vmem:[%s207_s0 + $0xc] sm:$0x1]   ;;  %s134_s19 = smov 112  }
   0x3   :  { %31 = vrot.lane.b32.xlu2 %v105_v2, %s133_s14  ;;  %s135_s20 = smov 96   ;;  %v106_v5 = vld [vmem:[%s207_s0 + $0xa] sm:$0x1]   ;;  %s136_s23 = smov 80   ;;  %v107_v6 = vld [vmem:[%s207_s0 + $0x9] sm:$0x1]  }
   0x4   :  { %v108_v7 = vld [vmem:[%s207_s0 + $0x8] sm:$0x1]   ;;  %s137_s28 = smov 72   ;;  %s138_s29 = smov 64   ;;  %v109_v8 = vld [vmem:[%s207_s0 + $0x7] sm:$0x1]  }
   0x5   :  { %s139_s3 = smov 56   ;;  %v110_v9 = vld [vmem:[%s207_s0 + $0x6] sm:$0x1]   ;;  %v111_v10 = vld [vmem:[%s207_s0 + $0x5] sm:$0x1]   ;;  %s140_s8 = smov 48  }
   0x6   :  { %s141_s9 = smov 40   ;;  %v112_v11 = vld [vmem:[%s207_s0 + $0x4] sm:$0x1]   ;;  %s142_s12 = smov 32   ;;  %v113_v12 = vld [vmem:[%s207_s0 + $0x3] sm:$0x1]  }
   0x7   :  { %v114_v13 = vld [vmem:[%s207_s0 + $0x2] sm:$0x1]   ;;  %s143_s17 = smov 24   ;;  %s144_s18 = smov 16   ;;  %v115_v14 = vld [vmem:[%s207_s0 + $0x1] sm:$0x1]  }
   0x8   :  { %s145_s21 = smov 8   ;;  %v2_v15 = vld [vmem:[%s207_s0] sm:$0x1]   ;;  %vm27_vm4 = vcmask 851712   ;;  %vm33_vm5 = vcmask 786112   ;;  %vm39_vm6 = vcmask 720512  }
   0x9   :  { %4 = vst.msk [vmem:[#allocation0] sm:$0x1] %vm3_vm0, %v2_v15   ;;  %vm45_vm7 = vcmask 654912   ;;  %vm51_vm8 = vcmask 589312   ;;  %vm57_vm9 = vcmask 523712   ;;  %vm63_vm10 = vcmask 458112  }
   0xa   :  { %13 = vrot.lane.b32.xlu0 %v102_v3, %s134_s19  ;;  %25 = vrot.lane.b32.xlu1 %v104_v4, %s135_s20  ;;  %vm69_vm11 = vcmask 392512   ;;  %vm75_vm12 = vcmask 326912   ;;  %vm81_vm13 = vcmask 261312   ;;  %vm87_vm14 = vcmask 195712  }
   0xb   :  { %37 = vrot.lane.b32.xlu2 %v106_v5, %s136_s23  ;;  %vm93_vm15 = vcmask 130112  }
  0x12   :  { %43 = vrot.lane.b32.xlu0 %v107_v6, %s137_s28  ;;  %49 = vrot.lane.b32.xlu1 %v108_v7, %s138_s29 }
  0x13   :  { %55 = vrot.lane.b32.xlu2 %v109_v8, %s139_s3 }
  0x1a   :  { %61 = vrot.lane.b32.xlu0 %v110_v9, %s140_s8  ;;  %67 = vrot.lane.b32.xlu1 %v111_v10, %s141_s9 }
  0x1b   :  { %73 = vrot.lane.b32.xlu2 %v112_v11, %s142_s12 }
  0x22   :  { %79 = vrot.lane.b32.xlu0 %v113_v12, %s143_s17  ;;  %85 = vrot.lane.b32.xlu1 %v114_v13, %s144_s18 }
  0x23   :  { %91 = vrot.lane.b32.xlu2 %v115_v14, %s145_s21 }
  0x5d   :  { %v32_v16 = vpop.permute.xlu2 %31  }
  0x65   :  { %v38_v17 = vpop.permute.xlu2 %37  }
  0x6d   :  { %v56_v18 = vpop.permute.xlu2 %55  }
  0x74   :  { %v8_v19 = vpop.permute.xlu0 %7   ;;  %v20_v20 = vpop.permute.xlu1 %19  }
  0x75   :  { %10 = vst.msk [vmem:[#allocation0] sm:$0x1] %vm9_vm1, %v8_v19   ;;  %v74_v21 = vpop.permute.xlu2 %73  }
  0x7c   :  { %v14_v22 = vpop.permute.xlu0 %13   ;;  %v26_v23 = vpop.permute.xlu1 %25  }
  0x7d   :  { %16 = vst.msk [vmem:[#allocation0] sm:$0x1] %vm15_vm2, %v14_v22   ;;  %v92_v24 = vpop.permute.xlu2 %91  }
  0x7e   :  { %22 = vst.msk [vmem:[#allocation0] sm:$0x1] %vm21_vm3, %v20_v20  }
  0x7f   :  { %28 = vst.msk [vmem:[#allocation0] sm:$0x1] %vm27_vm4, %v26_v23  }
  0x80   :  { %34 = vst.msk [vmem:[#allocation0] sm:$0x1] %vm33_vm5, %v32_v16  }
  0x81   :  { %40 = vst.msk [vmem:[#allocation0] sm:$0x1] %vm39_vm6, %v38_v17  }
  0x84   :  { %v44_v25 = vpop.permute.xlu0 %43   ;;  %v50_v26 = vpop.permute.xlu1 %49  }
  0x85   :  { %46 = vst.msk [vmem:[#allocation0] sm:$0x1] %vm45_vm7, %v44_v25  }
  0x86   :  { %52 = vst.msk [vmem:[#allocation0] sm:$0x1] %vm51_vm8, %v50_v26  }
  0x87   :  { %58 = vst.msk [vmem:[#allocation0] sm:$0x1] %vm57_vm9, %v56_v18  }
  0x8c   :  { %v62_v27 = vpop.permute.xlu0 %61   ;;  %v68_v28 = vpop.permute.xlu1 %67  }
  0x8d   :  { %64 = vst.msk [vmem:[#allocation0] sm:$0x1] %vm63_vm10, %v62_v27  }
  0x8e   :  { %70 = vst.msk [vmem:[#allocation0] sm:$0x1] %vm69_vm11, %v68_v28  }
  0x8f   :  { %76 = vst.msk [vmem:[#allocation0] sm:$0x1] %vm75_vm12, %v74_v21  }
  0x94   :  { %v80_v29 = vpop.permute.xlu0 %79   ;;  %v86_v30 = vpop.permute.xlu1 %85  }
  0x95   :  { %82 = vst.msk [vmem:[#allocation0] sm:$0x1] %vm81_vm13, %v80_v29  }
  0x96   :  { %88 = vst.msk [vmem:[#allocation0] sm:$0x1] %vm87_vm14, %v86_v30  }
  0x97   :  { %94 = vst.msk [vmem:[#allocation0] sm:$0x1] %vm93_vm15, %v92_v24  }
  0x9e   :  { %v97_v31 = vld [vmem:[#allocation0] sm:$0x1] }
  0x9f   :  { %100 = vst [vmem:[%s208_s1] sm:$0x1] %v97_v31 }

// kernel: upsample_bn_forward.3
= control target key start
LH: loop header
LB: loop body
LE: loop exit
PB: predicated region body
PF: predicated region fallthrough
CT: control target
= control target key end

     0   :  { %v27_v0 = vlaneseq  ;;  %vm687_vm3 = vmmov 0   ;;  %v688_v32 = vmov 0   ;;  %vm90_vm6 = vsmask.f32 256  ;;  %s907_s1 = inlined_call_operand.vmem [shape: bf16[3,128,128], index: 1, kind: input, shape index: {}]   ;;  %s908_s0 = inlined_call_operand.vmem [shape: f32[32,128], index: 0, kind: input, shape index: {}]   ;;  %s909_s2 = inlined_call_operand.vmem [shape: f32[1,128], index: 2, kind: input, shape index: {}]   ;;  %s910_s3 = inlined_call_operand.vmem [shape: f32[32,128], index: 3, kind: output, shape index: {0}]   ;;  %s911_s4 = inlined_call_operand.vmem [shape: f32[1,256], index: 4, kind: output, shape index: {1}]  }
   0x1   :  { %v667_v1 = vld [vmem:[%s907_s1 + $0x78] sm:$0xff]  ;;  %v666_v5 = vld [vmem:[%s907_s1 + $0x70] sm:$0xff]  ;;  %v665_v11 = vld [vmem:[%s907_s1 + $0x68] sm:$0xff]  ;;  %v807_v52 = vunpack.c.l.b16 %v688_v32  ;;  %v810_v53 = vunpack.c.h.b16 %v688_v32  ;;  %vm108_vm7 = vcmask 1040384   ;;  %vm111_vm13 = vsmask.f32 7424 }
   0x2   :  { %v659_v2 = vld [vmem:[%s907_s1 + $0x38] sm:$0xff]  ;;  %v28_v4 = vshrl.u32 %v27_v0, 7  ;;  %289 = vmatpush.bf16.msra.mxu0 %v667_v1  ;;  %v658_v6 = vld [vmem:[%s907_s1 + $0x30] sm:$0xff]  ;;  %676 = vmatpush.bf16.msra.mxu3 %v667_v1  ;;  %v657_v12 = vld [vmem:[%s907_s1 + $0x28] sm:$0xff] }
   0x3   :  { %v675_v3 = vld [vmem:[%s907_s1 + $0xb8] sm:$0xff]  ;;  %356 = vmatpush.bf16.msra.mxu1 %v659_v2  ;;  %v674_v7 = vld [vmem:[%s907_s1 + $0xb0] sm:$0xff]  ;;  %v673_v13 = vld [vmem:[%s907_s1 + $0xa8] sm:$0xff] }
   0x4   :  { %440 = vmatpush.bf16.msra.mxu2 %v675_v3  ;;  %v36_v8 = vand.u32 15, %v28_v4  ;;  %v29_v9 = vadd.s32 8, %v28_v4  ;;  %v19_v15 = vld [vmem:[%s908_s0] sm:$0xff]  ;;  %v20_v16 = vld [vmem:[%s908_s0 + $0x8] sm:$0xff]  ;;  %v21_v17 = vld [vmem:[%s908_s0 + $0x10] sm:$0xff]  ;;  %v30_v38 = vadd.s32 16, %v28_v4 }
   0x5   :  { %v22_v18 = vld [vmem:[%s908_s0 + $0x18] sm:$0xff]  ;;  %v23_v19 = vpack.c.bf16 %v19_v15, %v19_v15  ;;  %v24_v20 = vpack.c.bf16 %v20_v16, %v20_v16  ;;  %v25_v21 = vpack.c.bf16 %v21_v17, %v21_v17  ;;  %v664_v23 = vld [vmem:[%s907_s1 + $0x60] sm:$0xff]  ;;  %vm135_vm4 = vmpackc.low %vm687_vm3, %vm687_vm3  ;;  %v31_v41 = vadd.s32 24, %v28_v4 }
   0x6   :  { %v43_v10 = vand.u32 15, %v29_v9  ;;  %290 = vmatpush.bf16.msra.mxu0 %v666_v5  ;;  %677 = vmatpush.bf16.msra.mxu3 %v666_v5  ;;  %vm742_vm0 = vcmp.eq.s32.totalorder %v36_v8, 0  ;;  %v656_v24 = vld [vmem:[%s907_s1 + $0x20] sm:$0xff]  ;;  %v26_v25 = vpack.c.bf16 %v22_v18, %v22_v18  ;;  %v139_v34 = vsel %vm135_vm4, 65537, %v688_v32  ;;  %v663_v35 = vld [vmem:[%s907_s1 + $0x58] sm:$0xff]  ;;  %v662_v47 = vld [vmem:[%s907_s1 + $0x50] sm:$0xff] }
   0x7   :  { %357 = vmatpush.bf16.msra.mxu1 %v658_v6  ;;  %vm134_vm2 = vmpackc.low %vm742_vm0, %vm742_vm0  ;;  %v672_v26 = vld [vmem:[%s907_s1 + $0xa0] sm:$0xff]  ;;  %v84_v27 = vunpack.c.l.b16 %v23_v19  ;;  %v85_v28 = vunpack.c.l.b16 %v24_v20  ;;  %v86_v29 = vunpack.c.l.b16 %v25_v21  ;;  %v655_v36 = vld [vmem:[%s907_s1 + $0x18] sm:$0xff]  ;;  %v143_v44 = vunpack.c.l.b16 %v139_v34 }
   0x8   :  { %441 = vmatpush.bf16.msra.mxu2 %v674_v7  ;;  %vm758_vm1 = vcmp.eq.s32.totalorder %v43_v10, 15  ;;  %v87_v30 = vunpack.c.l.b16 %v26_v25  ;;  %v138_v33 = vsel %vm134_vm2, 65537, %v688_v32  ;;  %v671_v39 = vld [vmem:[%s907_s1 + $0x98] sm:$0xff]  ;;  %v654_v48 = vld [vmem:[%s907_s1 + $0x10] sm:$0xff]  ;;  %v50_v49 = vand.u32 15, %v30_v38  ;;  %v661_v60 = vld [vmem:[%s907_s1 + $0x48] sm:$0xff] }
   0x9   :  { %vm177_vm5 = vmpackc.low %vm758_vm1, %vm758_vm1  ;;  %v777_v31 = vpack.c.b16 %v85_v28, %v84_v27  ;;  %v142_v43 = vunpack.c.l.b16 %v138_v33  ;;  %v670_v50 = vld [vmem:[%s907_s1 + $0x90] sm:$0xff]  ;;  %v57_v54 = vand.u32 15, %v31_v41  ;;  %v812_v57 = vunpack.i.l.s16 %v143_v44  ;;  %v653_v61 = vld [vmem:[%s907_s1 + $0x8] sm:$0xff] }
   0xa   :  { %291 = vmatpush.bf16.msra.mxu0 %v665_v11  ;;  %678 = vmatpush.bf16.msra.mxu3 %v665_v11  ;;  %v181_v37 = vsel %vm177_vm5, 65537, %v688_v32  ;;  %v793_v45 = vpack.c.b16 %v87_v30, %v86_v29  ;;  %vm821_vm8 = vcmp.eq.s32.totalorder %v50_v49, 0  ;;  %v669_v63 = vld [vmem:[%s907_s1 + $0x88] sm:$0xff]  ;;  %vm835_vm10 = vmand %vm108_vm7, %vm90_vm6  ;;  %v660_v6 = vld [vmem:[%s907_s1 + $0x40] sm:$0xff]  ;;  %vm119_vm4 = vcmask 1047552  }
   0xb   :  { %358 = vmatpush.bf16.msra.mxu1 %v657_v12  ;;  %v92_v40 = vshrl.u32 %v777_v31, 16  ;;  %v95_v42 = vshll.u32 %v777_v31, 16  ;;  %v185_v46 = vunpack.c.l.b16 %v181_v37  ;;  %v516_v56 = vunpack.i.l.s16 %v142_v43  ;;  %vm136_vm0 = vmpackc.low %vm821_vm8, %vm821_vm8  ;;  %v652_v7 = vld [vmem:[%s907_s1] sm:$0xff] }
   0xc   :  { %442 = vmatpush.bf16.msra.mxu2 %v673_v13  ;;  %v102_v58 = vshll.u32 %v793_v45, 16  ;;  %vm829_vm9 = vcmp.eq.s32.totalorder %v57_v54, 15  ;;  %vm153_vm12 = vcmp.ne.s32.totalorder %v812_v57, %v810_v53  ;;  %vm194_vm14 = vcmp.ne.s32.totalorder %v812_v57, %v807_v52  ;;  %v668_v8 = vld [vmem:[%s907_s1 + $0x80] sm:$0xff]  ;;  %vm120_vm8 = vmand %vm119_vm4, %vm111_vm13 }
   0xd   :  { %v804_v51 = vrot.slane %v92_v40, 7  ;;  %v112_v55 = vrot.slane %v95_v42, 1  ;;  %v521_v59 = vunpack.i.l.s16 %v185_v46  ;;  %vm152_vm11 = vcmp.ne.s32.totalorder %v516_v56, %v807_v52  ;;  %vm179_vm1 = vmpackc.low %vm829_vm9, %vm829_vm9  ;;  %v686_v30 = vld [vmem:[%s909_s2] ss:$0 sm:$0xff] }
   0xe   :  { %292 = vmatpush.bf16.msra.mxu0 %v664_v23  ;;  %679 = vmatpush.bf16.msra.mxu3 %v664_v23  ;;  %v114_v5 = vrot.slane %v102_v58, 1  ;;  %vm154_vm2 = vmpackc.low %vm153_vm12, %vm152_vm11  ;;  %v140_v11 = vsel %vm136_vm0, 65537, %v688_v32  ;;  %v183_v13 = vsel %vm179_vm1, 65537, %v688_v32  ;;  %v99_v15 = vshrl.u32 %v793_v45, 16 }
   0xf   :  { %359 = vmatpush.bf16.msra.mxu1 %v656_v24  ;;  %v97_v1 = vor.u32 %v95_v42, %v804_v51  ;;  %v113_v4 = vor.u32 %v112_v55, %v92_v40  ;;  %vm195_vm15 = vcmp.ne.s32.totalorder %v521_v59, %v810_v53  ;;  %v144_v16 = vunpack.c.l.b16 %v140_v11 }
  0x10   :  { %443 = vmatpush.bf16.msra.mxu2 %v672_v26  ;;  %vm196_vm3 = vmpackc.low %vm195_vm15, %vm194_vm14  ;;  %v187_v17 = vunpack.c.l.b16 %v183_v13  ;;  %v101_v18 = vrot.slane %v99_v15, 7  ;;  %v116_v22 = vor.u32 %v114_v5, %v99_v15 }
  0x11   :  { %v110_v9 = vsel %vm835_vm10, 0, %v97_v1  ;;  %v115_v10 = vsel %vm111_vm13, %v113_v4, %v114_v5  ;;  %v518_v19 = vunpack.i.l.s16 %v144_v16 }
  0x12   :  { %293 = vmatpush.bf16.msra.mxu0 %v663_v35  ;;  %680 = vmatpush.bf16.msra.mxu3 %v663_v35  ;;  %v162_v12 = vsel %vm154_vm2, 0, %v110_v9  ;;  %v204_v14 = vsel %vm196_vm3, 0, %v115_v10  ;;  %v523_v20 = vunpack.i.l.s16 %v187_v17  ;;  %v104_v21 = vor.u32 %v102_v58, %v101_v18 }
  0x13   :  { %360 = vmatpush.bf16.msra.mxu1 %v655_v36  ;;  %vm159_vm5 = vcmp.ne.s32.totalorder %v518_v19, %v807_v52  ;;  %v121_v24 = vsel %vm120_vm8, %v116_v22, 0 }
  0x14   :  { %444 = vmatpush.bf16.msra.mxu2 %v671_v39  ;;  %vm202_vm9 = vcmp.ne.s32.totalorder %v523_v20, %v810_v53  ;;  %v105_v23 = vsel %vm90_vm6, %v804_v51, %v104_v21  ;;  %vm161_vm10 = vmpackc.low %vm153_vm12, %vm159_vm5  ;;  %vm505_vm6 = vcmp.lt.s32.totalorder %v27_v0, 256 }
  0x15   :  { %vm203_vm11 = vmpackc.low %vm202_vm9, %vm194_vm14  ;;  %v163_v25 = vsel %vm161_vm10, 0, %v105_v23 }
  0x16   :  { %294 = vmatpush.bf16.msra.mxu0 %v662_v47  ;;  %681 = vmatpush.bf16.msra.mxu3 %v662_v47  ;;  %v205_v26 = vsel %vm203_vm11, 0, %v121_v24 }
  0x17   :  { %361 = vmatpush.bf16.msra.mxu1 %v654_v48 }
  0x18   :  { %445 = vmatpush.bf16.msra.mxu2 %v670_v50 }
  0x1a   :  { %295 = vmatpush.bf16.msra.mxu0 %v661_v60  ;;  %682 = vmatpush.bf16.msra.mxu3 %v661_v60 }
  0x1b   :  { %362 = vmatpush.bf16.msra.mxu1 %v653_v61 }
  0x1c   :  { %446 = vmatpush.bf16.msra.mxu2 %v669_v63 }
  0x1e   :  { %296 = vmatpush.bf16.msra.mxu0 %v660_v6  ;;  %683 = vmatpush.bf16.msra.mxu3 %v660_v6 }
  0x1f   :  { %363 = vmatpush.bf16.msra.mxu1 %v652_v7 }
  0x20   :  { %447 = vmatpush.bf16.msra.mxu2 %v668_v8 }
  0x21   :  { %297 = vmatmul.bf16.vlgmr.msra.gmra.mxu0 %v777_v31  ;;  %302 = vmatmul.bf16.vlgmr.msra.gmra.mxu3 %v793_v45 }
  0x22   :  { %364 = vmatmul.bf16.vlgmr.msra.gmra.mxu1 %v162_v12 }
  0x23   :  { %448 = vmatmul.bf16.vlgmr.msra.gmra.mxu2 %v204_v14 }
  0x32   :  { %369 = vmatmul.bf16.gmra.mxu1 %v163_v25 }
  0x33   :  { %453 = vmatmul.bf16.gmra.mxu2 %v205_v26 }
  0x9e   :  { %v298_v28 = vpop.f32.mrf.mxu0 }
  0x9f   :  { %v365_v27 = vpop.f32.mrf.mxu1 }
  0xa0   :  { %v366_v29 = vadd.f32 %v365_v27, %v298_v28 }
  0xa4   :  { %v303_v41 = vpop.f32.mrf.mxu3 }
  0xa6   :  { %v449_v31 = vpop.f32.mrf.mxu2  ;;  %v300_v35 = vpop.f32.mrf.mxu0 }
  0xa7   :  { %v459_v32 = vadd.f32 %v449_v31, %v366_v29  ;;  %v367_v33 = vpop.f32.mrf.mxu1 }
  0xa8   :  { %v368_v36 = vadd.f32 %v367_v33, %v300_v35 }
  0xa9   :  { %v467_v34 = vadd.f32 %v686_v30, %v459_v32 }
  0xab   :  { %471 = vst [vmem:[%s910_s3] sm:$0xff] %v467_v34  ;;  %v484_v51 = vmul.f32 %v467_v34, %v467_v34 }
  0xac   :  { %v305_v47 = vpop.f32.mrf.mxu3 }
  0xae   :  { %v451_v37 = vpop.f32.mrf.mxu2 }
  0xaf   :  { %v460_v38 = vadd.f32 %v451_v37, %v368_v36  ;;  %v370_v39 = vpop.f32.mrf.mxu1 }
  0xb0   :  { %v371_v42 = vadd.f32 %v370_v39, %v303_v41 }
  0xb1   :  { %v468_v40 = vadd.f32 %v686_v30, %v460_v38 }
  0xb3   :  { %472 = vst [vmem:[%s910_s3 + $0x8] sm:$0xff] %v468_v40  ;;  %v485_v48 = vmul.f32 %v468_v40, %v468_v40  ;;  %v475_v52 = vadd.f32 %v468_v40, %v467_v34 }
  0xb5   :  { %v488_v55 = vadd.f32 %v485_v48, %v484_v51 }
  0xb6   :  { %v454_v43 = vpop.f32.mrf.mxu2 }
  0xb7   :  { %v461_v44 = vadd.f32 %v454_v43, %v371_v42  ;;  %v372_v46 = vpop.f32.mrf.mxu1 }
  0xb8   :  { %v373_v49 = vadd.f32 %v372_v46, %v305_v47 }
  0xb9   :  { %v469_v45 = vadd.f32 %v686_v30, %v461_v44 }
  0xbb   :  { %473 = vst [vmem:[%s910_s3 + $0x10] sm:$0xff] %v469_v45  ;;  %v486_v53 = vmul.f32 %v469_v45, %v469_v45  ;;  %v476_v56 = vadd.f32 %v475_v52, %v469_v45 }
  0xbd   :  { %v489_v58 = vadd.f32 %v488_v55, %v486_v53 }
  0xbe   :  { %v456_v50 = vpop.f32.mrf.mxu2 }
  0xbf   :  { %v462_v54 = vadd.f32 %v456_v50, %v373_v49 }
  0xc1   :  { %v470_v57 = vadd.f32 %v686_v30, %v462_v54 }
  0xc3   :  { %474 = vst [vmem:[%s910_s3 + $0x18] sm:$0xff] %v470_v57  ;;  %v477_v59 = vadd.f32 %v476_v56, %v470_v57  ;;  %v487_v60 = vmul.f32 %v470_v57, %v470_v57 }
  0xc5   :  { %v478_v61 = vrot.slane %v477_v59, 4  ;;  %v490_v62 = vadd.f32 %v489_v58, %v487_v60 }
  0xc7   :  { %v479_v63 = vadd.f32 %v478_v61, %v477_v59  ;;  %v491_v1 = vrot.slane %v490_v62, 4 }
  0xc9   :  { %v480_v2 = vrot.slane %v479_v63, 2  ;;  %v492_v3 = vadd.f32 %v491_v1, %v490_v62 }
  0xcb   :  { %v481_v4 = vadd.f32 %v480_v2, %v479_v63  ;;  %v493_v5 = vrot.slane %v492_v3, 2 }
  0xcd   :  { %v494_v6 = vadd.f32 %v493_v5, %v492_v3  ;;  %v482_v7 = vrot.slane %v481_v4, 1 }
  0xcf   :  { %v495_v8 = vrot.slane %v494_v6, 1  ;;  %v483_v10 = vadd.f32 %v482_v7, %v481_v4 }
  0xd1   :  { %v496_v9 = vadd.f32 %v495_v8, %v494_v6 }
  0xd3   :  { %v499_v11 = vrot.slane %v496_v9, 7 }
  0xd5   :  { %v501_v12 = vsel %vm108_vm7, %v483_v10, %v499_v11 }
  0xd6   :  { %507 = vst.msk [vmem:[%s911_s4] sm:$0x3] %vm505_vm6, %v501_v12 }

// kernel: upsample_bn_forward.4
= control target key start
LH: loop header
LB: loop body
LE: loop exit
PB: predicated region body
PF: predicated region fallthrough
CT: control target
= control target key end

     0   :  { %v61_v0 = vlaneseq  ;;  %v723_v27 = vmov 0   ;;  %vm724_vm3 = vmmov 0   ;;  %vm124_vm10 = vsmask.f32 256  ;;  %s963_s1 = inlined_call_operand.vmem [shape: bf16[3,128,128], index: 1, kind: input, shape index: {}]   ;;  %s964_s0 = inlined_call_operand.vmem [shape: f32[32,128], index: 0, kind: input, shape index: {}]   ;;  %s965_s3 = inlined_call_operand.vmem [shape: f32[1,128], index: 3, kind: input, shape index: {}]   ;;  %s966_s4 = inlined_call_operand.vmem [shape: f32[1,128], index: 4, kind: input, shape index: {}]   ;;  %s967_s2 = inlined_call_operand.vmem [shape: f32[1,128], index: 2, kind: input, shape index: {}]   ;;  %s968_s5 = inlined_call_operand.vmem [shape: f32[32,128], index: 5, kind: output, shape index: {0}]   ;;  %s969_s6 = inlined_call_operand.vmem [shape: f32[1,256], index: 6, kind: output, shape index: {1}]  }
   0x1   :  { %v701_v1 = vld [vmem:[%s963_s1 + $0x78] sm:$0xff]  ;;  %v700_v5 = vld [vmem:[%s963_s1 + $0x70] sm:$0xff]  ;;  %v699_v10 = vld [vmem:[%s963_s1 + $0x68] sm:$0xff]  ;;  %v827_v28 = vunpack.c.l.b16 %v723_v27  ;;  %v847_v47 = vunpack.c.h.b16 %v723_v27  ;;  %vm142_vm11 = vcmask 1040384  }
   0x2   :  { %v693_v2 = vld [vmem:[%s963_s1 + $0x38] sm:$0xff]  ;;  %v62_v4 = vshrl.u32 %v61_v0, 7  ;;  %323 = vmatpush.bf16.msra.mxu0 %v701_v1  ;;  %v692_v6 = vld [vmem:[%s963_s1 + $0x30] sm:$0xff]  ;;  %710 = vmatpush.bf16.msra.mxu3 %v701_v1  ;;  %v691_v11 = vld [vmem:[%s963_s1 + $0x28] sm:$0xff] }
   0x3   :  { %v709_v3 = vld [vmem:[%s963_s1 + $0xb8] sm:$0xff]  ;;  %390 = vmatpush.bf16.msra.mxu1 %v693_v2  ;;  %v708_v7 = vld [vmem:[%s963_s1 + $0xb0] sm:$0xff]  ;;  %v707_v13 = vld [vmem:[%s963_s1 + $0xa8] sm:$0xff] }
   0x4   :  { %474 = vmatpush.bf16.msra.mxu2 %v709_v3  ;;  %v63_v8 = vadd.s32 8, %v62_v4  ;;  %v70_v9 = vand.u32 15, %v62_v4  ;;  %v698_v14 = vld [vmem:[%s963_s1 + $0x60] sm:$0xff]  ;;  %v26_v16 = vld [vmem:[%s964_s0 + $0x8] sm:$0xff]  ;;  %v27_v17 = vld [vmem:[%s964_s0 + $0x10] sm:$0xff]  ;;  %v64_v32 = vadd.s32 16, %v62_v4 }
   0x5   :  { %v25_v15 = vld [vmem:[%s964_s0] sm:$0xff]  ;;  %v28_v19 = vld [vmem:[%s964_s0 + $0x18] sm:$0xff]  ;;  %vm169_vm4 = vmpackc.low %vm724_vm3, %vm724_vm3  ;;  %v830_v33 = vadd.s32 24, %v62_v4 }
   0x6   :  { %324 = vmatpush.bf16.msra.mxu0 %v700_v5  ;;  %v77_v12 = vand.u32 15, %v63_v8  ;;  %711 = vmatpush.bf16.msra.mxu3 %v700_v5  ;;  %vm800_vm0 = vcmp.eq.s32.totalorder %v70_v9, 0  ;;  %v720_v20 = vld [vmem:[%s965_s3] ss:$0 sm:$0xff]  ;;  %v173_v36 = vsel %vm169_vm4, 65537, %v723_v27  ;;  %v697_v38 = vld [vmem:[%s963_s1 + $0x58] sm:$0xff]  ;;  %vm883_vm15 = vmand %vm142_vm11, %vm124_vm10 }
   0x7   :  { %391 = vmatpush.bf16.msra.mxu1 %v692_v6  ;;  %v690_v21 = vld [vmem:[%s963_s1 + $0x20] sm:$0xff]  ;;  %v33_v25 = vmul.f32 %v720_v20, %v25_v15  ;;  %v34_v26 = vmul.f32 %v720_v20, %v26_v16  ;;  %vm168_vm2 = vmpackc.low %vm800_vm0, %vm800_vm0  ;;  %v35_v29 = vmul.f32 %v720_v20, %v27_v17  ;;  %v36_v31 = vmul.f32 %v720_v20, %v28_v19  ;;  %v689_v39 = vld [vmem:[%s963_s1 + $0x18] sm:$0xff] }
   0x8   :  { %475 = vmatpush.bf16.msra.mxu2 %v708_v7  ;;  %v721_v22 = vld [vmem:[%s966_s4] ss:$0 sm:$0xff]  ;;  %vm816_vm1 = vcmp.eq.s32.totalorder %v77_v12, 15  ;;  %v172_v30 = vsel %vm168_vm2, 65537, %v723_v27  ;;  %v705_v40 = vld [vmem:[%s963_s1 + $0x98] sm:$0xff]  ;;  %v177_v41 = vunpack.c.l.b16 %v173_v36  ;;  %v84_v48 = vand.u32 15, %v64_v32 }
   0x9   :  { %v706_v24 = vld [vmem:[%s963_s1 + $0xa0] sm:$0xff]  ;;  %v41_v34 = vadd.f32 %v721_v22, %v33_v25  ;;  %v42_v35 = vadd.f32 %v721_v22, %v34_v26  ;;  %v176_v37 = vunpack.c.l.b16 %v172_v30  ;;  %vm211_vm5 = vmpackc.low %vm816_vm1, %vm816_vm1  ;;  %v43_v42 = vadd.f32 %v721_v22, %v35_v29  ;;  %v696_v53 = vld [vmem:[%s963_s1 + $0x50] sm:$0xff] }
   0xa   :  { %325 = vmatpush.bf16.msra.mxu0 %v699_v10  ;;  %712 = vmatpush.bf16.msra.mxu3 %v699_v10  ;;  %v44_v43 = vadd.f32 %v721_v22, %v36_v31  ;;  %v215_v44 = vsel %vm211_vm5, 65537, %v723_v27  ;;  %v688_v54 = vld [vmem:[%s963_s1 + $0x10] sm:$0xff]  ;;  %v91_v58 = vand.u32 15, %v830_v33  ;;  %v859_v61 = vunpack.i.l.s16 %v177_v41  ;;  %v695_v6 = vld [vmem:[%s963_s1 + $0x48] sm:$0xff]  ;;  %v694_v18 = vld [vmem:[%s963_s1 + $0x40] sm:$0xff] }
   0xb   :  { %392 = vmatpush.bf16.msra.mxu1 %v691_v11  ;;  %vm45_vm6 = vcmp.ge.f32.partialorder %v41_v34, 0.0  ;;  %vm46_vm7 = vcmp.ge.f32.partialorder %v42_v35, 0.0  ;;  %v49_v45 = vmul.f32 0.01, %v41_v34  ;;  %v50_v46 = vmul.f32 0.01, %v42_v35 }
   0xc   :  { %476 = vmatpush.bf16.msra.mxu2 %v707_v13  ;;  %vm47_vm8 = vcmp.ge.f32.partialorder %v43_v42, 0.0  ;;  %vm48_vm9 = vcmp.ge.f32.partialorder %v44_v43, 0.0  ;;  %v51_v51 = vmul.f32 0.01, %v43_v42  ;;  %v52_v52 = vmul.f32 0.01, %v44_v43 }
   0xd   :  { %v53_v49 = vsel %vm45_vm6, %v41_v34, %v49_v45  ;;  %v54_v50 = vsel %vm46_vm7, %v42_v35, %v50_v46  ;;  %v219_v57 = vunpack.c.l.b16 %v215_v44  ;;  %v704_v59 = vld [vmem:[%s963_s1 + $0x90] sm:$0xff]  ;;  %v550_v60 = vunpack.i.l.s16 %v176_v37  ;;  %v687_v7 = vld [vmem:[%s963_s1 + $0x8] sm:$0xff]  ;;  %v686_v19 = vld [vmem:[%s963_s1] sm:$0xff] }
   0xe   :  { %326 = vmatpush.bf16.msra.mxu0 %v698_v14  ;;  %713 = vmatpush.bf16.msra.mxu3 %v698_v14  ;;  %v57_v55 = vpack.c.bf16 %v53_v49, %v53_v49  ;;  %v58_v56 = vpack.c.bf16 %v54_v50, %v54_v50  ;;  %v55_v62 = vsel %vm47_vm8, %v43_v42, %v51_v51  ;;  %vm869_vm12 = vcmp.eq.s32.totalorder %v84_v48, 0  ;;  %v703_v12 = vld [vmem:[%s963_s1 + $0x88] sm:$0xff]  ;;  %v702_v23 = vld [vmem:[%s963_s1 + $0x80] sm:$0xff] }
   0xf   :  { %393 = vmatpush.bf16.msra.mxu1 %v690_v21  ;;  %v56_v63 = vsel %vm48_vm9, %v44_v43, %v52_v52  ;;  %v59_v3 = vpack.c.bf16 %v55_v62, %v55_v62  ;;  %v555_v5 = vunpack.i.l.s16 %v219_v57  ;;  %vm186_vm13 = vcmp.ne.s32.totalorder %v550_v60, %v827_v28  ;;  %vm170_vm3 = vmpackc.low %vm869_vm12, %vm869_vm12  ;;  %v722_v51 = vld [vmem:[%s967_s2] ss:$0 sm:$0xff] }
  0x10   :  { %477 = vmatpush.bf16.msra.mxu2 %v706_v24  ;;  %v118_v1 = vunpack.c.l.b16 %v57_v55  ;;  %v119_v2 = vunpack.c.l.b16 %v58_v56  ;;  %v60_v4 = vpack.c.bf16 %v56_v63, %v56_v63  ;;  %vm877_vm14 = vcmp.eq.s32.totalorder %v91_v58, 15 }
  0x11   :  { %v120_v9 = vunpack.c.l.b16 %v59_v3  ;;  %vm187_vm0 = vcmp.ne.s32.totalorder %v859_v61, %v847_v47  ;;  %vm228_vm1 = vcmp.ne.s32.totalorder %v859_v61, %v827_v28  ;;  %vm229_vm2 = vcmp.ne.s32.totalorder %v555_v5, %v847_v47  ;;  %vm213_vm4 = vmpackc.low %vm877_vm14, %vm877_vm14 }
  0x12   :  { %327 = vmatpush.bf16.msra.mxu0 %v697_v38  ;;  %714 = vmatpush.bf16.msra.mxu3 %v697_v38  ;;  %v122_v8 = vpack.c.b16 %v119_v2, %v118_v1  ;;  %v121_v10 = vunpack.c.l.b16 %v60_v4  ;;  %vm188_vm5 = vmpackc.low %vm187_vm0, %vm186_vm13  ;;  %vm145_vm6 = vsmask.f32 7424  ;;  %v174_v30 = vsel %vm170_vm3, 65537, %v723_v27 }
  0x13   :  { %394 = vmatpush.bf16.msra.mxu1 %v689_v39  ;;  %vm917_vm7 = vmpackc.low %vm229_vm2, %vm228_vm1  ;;  %v217_v33 = vsel %vm213_vm4, 65537, %v723_v27  ;;  %v178_v37 = vunpack.c.l.b16 %v174_v30  ;;  %vm153_vm8 = vcmask 1047552  }
  0x14   :  { %478 = vmatpush.bf16.msra.mxu2 %v705_v40  ;;  %v126_v14 = vshrl.u32 %v122_v8, 16  ;;  %v129_v15 = vshll.u32 %v122_v8, 16  ;;  %v123_v17 = vpack.c.b16 %v121_v10, %v120_v9  ;;  %v221_v38 = vunpack.c.l.b16 %v217_v33  ;;  %vm154_vm12 = vmand %vm153_vm8, %vm145_vm6 }
  0x15   :  { %v552_v40 = vunpack.i.l.s16 %v178_v37 }
  0x16   :  { %328 = vmatpush.bf16.msra.mxu0 %v696_v53  ;;  %715 = vmatpush.bf16.msra.mxu3 %v696_v53  ;;  %v128_v20 = vrot.slane %v126_v14, 7  ;;  %v146_v21 = vrot.slane %v129_v15, 1  ;;  %v136_v22 = vshll.u32 %v123_v17, 16  ;;  %v133_v36 = vshrl.u32 %v123_v17, 16 }
  0x17   :  { %395 = vmatpush.bf16.msra.mxu1 %v688_v54  ;;  %v557_v41 = vunpack.i.l.s16 %v221_v38  ;;  %vm193_vm9 = vcmp.ne.s32.totalorder %v552_v40, %v827_v28 }
  0x18   :  { %479 = vmatpush.bf16.msra.mxu2 %v704_v59  ;;  %v131_v24 = vor.u32 %v129_v15, %v128_v20  ;;  %v147_v25 = vor.u32 %v146_v21, %v126_v14  ;;  %v148_v26 = vrot.slane %v136_v22, 1  ;;  %v135_v39 = vrot.slane %v133_v36, 7  ;;  %vm195_vm14 = vmpackc.low %vm187_vm0, %vm193_vm9 }
  0x19   :  { %vm236_vm13 = vcmp.ne.s32.totalorder %v557_v41, %v847_v47 }
  0x1a   :  { %329 = vmatpush.bf16.msra.mxu0 %v695_v6  ;;  %716 = vmatpush.bf16.msra.mxu3 %v695_v6  ;;  %v144_v31 = vsel %vm883_vm15, 0, %v131_v24  ;;  %v149_v32 = vsel %vm145_vm6, %v147_v25, %v148_v26  ;;  %v138_v42 = vor.u32 %v136_v22, %v135_v39  ;;  %v150_v27 = vor.u32 %v148_v26, %v133_v36  ;;  %vm237_vm15 = vmpackc.low %vm236_vm13, %vm228_vm1 }
  0x1b   :  { %396 = vmatpush.bf16.msra.mxu1 %v687_v7  ;;  %v196_v34 = vsel %vm188_vm5, 0, %v144_v31  ;;  %v238_v35 = vsel %vm917_vm7, 0, %v149_v32 }
  0x1c   :  { %480 = vmatpush.bf16.msra.mxu2 %v703_v12  ;;  %v139_v43 = vsel %vm124_vm10, %v128_v20, %v138_v42  ;;  %v155_v44 = vsel %vm154_vm12, %v150_v27, 0  ;;  %vm539_vm10 = vcmp.lt.s32.totalorder %v61_v0, 256 }
  0x1d   :  { %v197_v45 = vsel %vm195_vm14, 0, %v139_v43  ;;  %v239_v46 = vsel %vm237_vm15, 0, %v155_v44 }
  0x1e   :  { %330 = vmatpush.bf16.msra.mxu0 %v694_v18  ;;  %717 = vmatpush.bf16.msra.mxu3 %v694_v18 }
  0x1f   :  { %397 = vmatpush.bf16.msra.mxu1 %v686_v19 }
  0x20   :  { %481 = vmatpush.bf16.msra.mxu2 %v702_v23 }
  0x21   :  { %331 = vmatmul.bf16.vlgmr.msra.gmra.mxu0 %v122_v8  ;;  %336 = vmatmul.bf16.vlgmr.msra.gmra.mxu3 %v123_v17 }
  0x22   :  { %398 = vmatmul.bf16.vlgmr.msra.gmra.mxu1 %v196_v34 }
  0x23   :  { %482 = vmatmul.bf16.vlgmr.msra.gmra.mxu2 %v238_v35 }
  0x32   :  { %403 = vmatmul.bf16.gmra.mxu1 %v197_v45 }
  0x33   :  { %487 = vmatmul.bf16.gmra.mxu2 %v239_v46 }
  0x9e   :  { %v332_v49 = vpop.f32.mrf.mxu0 }
  0x9f   :  { %v399_v48 = vpop.f32.mrf.mxu1 }
  0xa0   :  { %v400_v50 = vadd.f32 %v399_v48, %v332_v49 }
  0xa4   :  { %v337_v60 = vpop.f32.mrf.mxu3 }
  0xa6   :  { %v483_v52 = vpop.f32.mrf.mxu2  ;;  %v334_v55 = vpop.f32.mrf.mxu0 }
  0xa7   :  { %v493_v53 = vadd.f32 %v483_v52, %v400_v50  ;;  %v401_v47 = vpop.f32.mrf.mxu1 }
  0xa8   :  { %v402_v28 = vadd.f32 %v401_v47, %v334_v55 }
  0xa9   :  { %v501_v54 = vadd.f32 %v722_v51, %v493_v53 }
  0xab   :  { %505 = vst [vmem:[%s968_s5] sm:$0xff] %v501_v54  ;;  %v518_v7 = vmul.f32 %v501_v54, %v501_v54 }
  0xac   :  { %v339_v3 = vpop.f32.mrf.mxu3 }
  0xae   :  { %v485_v56 = vpop.f32.mrf.mxu2 }
  0xaf   :  { %v494_v57 = vadd.f32 %v485_v56, %v402_v28  ;;  %v404_v58 = vpop.f32.mrf.mxu1 }
  0xb0   :  { %v405_v61 = vadd.f32 %v404_v58, %v337_v60 }
  0xb1   :  { %v502_v59 = vadd.f32 %v722_v51, %v494_v57 }
  0xb3   :  { %506 = vst [vmem:[%s968_s5 + $0x8] sm:$0xff] %v502_v59  ;;  %v519_v4 = vmul.f32 %v502_v59, %v502_v59  ;;  %v509_v8 = vadd.f32 %v502_v59, %v501_v54 }
  0xb5   :  { %v522_v11 = vadd.f32 %v519_v4, %v518_v7 }
  0xb6   :  { %v488_v62 = vpop.f32.mrf.mxu2 }
  0xb7   :  { %v495_v63 = vadd.f32 %v488_v62, %v405_v61  ;;  %v406_v2 = vpop.f32.mrf.mxu1 }
  0xb8   :  { %v407_v5 = vadd.f32 %v406_v2, %v339_v3 }
  0xb9   :  { %v503_v1 = vadd.f32 %v722_v51, %v495_v63 }
  0xbb   :  { %507 = vst [vmem:[%s968_s5 + $0x10] sm:$0xff] %v503_v1  ;;  %v520_v9 = vmul.f32 %v503_v1, %v503_v1  ;;  %v510_v12 = vadd.f32 %v509_v8, %v503_v1 }
  0xbd   :  { %v523_v14 = vadd.f32 %v522_v11, %v520_v9 }
  0xbe   :  { %v490_v6 = vpop.f32.mrf.mxu2 }
  0xbf   :  { %v496_v10 = vadd.f32 %v490_v6, %v407_v5 }
  0xc1   :  { %v504_v13 = vadd.f32 %v722_v51, %v496_v10 }
  0xc3   :  { %508 = vst [vmem:[%s968_s5 + $0x18] sm:$0xff] %v504_v13  ;;  %v511_v15 = vadd.f32 %v510_v12, %v504_v13  ;;  %v521_v16 = vmul.f32 %v504_v13, %v504_v13 }
  0xc5   :  { %v512_v17 = vrot.slane %v511_v15, 4  ;;  %v524_v18 = vadd.f32 %v523_v14, %v521_v16 }
  0xc7   :  { %v513_v19 = vadd.f32 %v512_v17, %v511_v15  ;;  %v525_v20 = vrot.slane %v524_v18, 4 }
  0xc9   :  { %v514_v21 = vrot.slane %v513_v19, 2  ;;  %v526_v22 = vadd.f32 %v525_v20, %v524_v18 }
  0xcb   :  { %v515_v23 = vadd.f32 %v514_v21, %v513_v19  ;;  %v527_v24 = vrot.slane %v526_v22, 2 }
  0xcd   :  { %v528_v25 = vadd.f32 %v527_v24, %v526_v22  ;;  %v516_v26 = vrot.slane %v515_v23, 1 }
  0xcf   :  { %v529_v29 = vrot.slane %v528_v25, 1  ;;  %v517_v31 = vadd.f32 %v516_v26, %v515_v23 }
  0xd1   :  { %v530_v30 = vadd.f32 %v529_v29, %v528_v25 }
  0xd3   :  { %v533_v32 = vrot.slane %v530_v30, 7 }
  0xd5   :  { %v535_v33 = vsel %vm142_vm11, %v517_v31, %v533_v32 }
  0xd6   :  { %541 = vst.msk [vmem:[%s969_s6] sm:$0x3] %vm539_vm10, %v535_v33 }

// kernel: upsample_bn_forward.5
= control target key start
LH: loop header
LB: loop body
LE: loop exit
PB: predicated region body
PF: predicated region fallthrough
CT: control target
= control target key end

     0   :  { %s106_s0 = inlined_call_operand.vmem [shape: f32[32,128], index: 0, kind: input, shape index: {}]   ;;  %s107_s1 = inlined_call_operand.vmem [shape: f32[1,128], index: 1, kind: input, shape index: {}]   ;;  %s108_s2 = inlined_call_operand.vmem [shape: f32[1,128], index: 2, kind: input, shape index: {}]   ;;  %s109_s3 = inlined_call_operand.vmem [shape: f32[32,128], index: 3, kind: output, shape index: {}]  }
   0x1   :  { %v14_v0 = vld [vmem:[%s106_s0] sm:$0xff]  ;;  %v15_v3 = vld [vmem:[%s106_s0 + $0x8] sm:$0xff]  ;;  %v16_v6 = vld [vmem:[%s106_s0 + $0x10] sm:$0xff] }
   0x2   :  { %v54_v1 = vld [vmem:[%s107_s1] ss:$0 sm:$0xff]  ;;  %v17_v7 = vld [vmem:[%s106_s0 + $0x18] sm:$0xff] }
   0x3   :  { %v55_v2 = vld [vmem:[%s108_s2] ss:$0 sm:$0xff]  ;;  %v22_v4 = vmul.f32 %v54_v1, %v14_v0  ;;  %v23_v5 = vmul.f32 %v54_v1, %v15_v3  ;;  %v24_v8 = vmul.f32 %v54_v1, %v16_v6  ;;  %v25_v9 = vmul.f32 %v54_v1, %v17_v7 }
   0x5   :  { %v30_v10 = vadd.f32 %v55_v2, %v22_v4  ;;  %v31_v11 = vadd.f32 %v55_v2, %v23_v5  ;;  %v32_v12 = vadd.f32 %v55_v2, %v24_v8  ;;  %v33_v13 = vadd.f32 %v55_v2, %v25_v9 }
   0x7   :  { %vm34_vm0 = vcmp.ge.f32.partialorder %v30_v10, 0.0  ;;  %v38_v14 = vmul.f32 0.01, %v30_v10  ;;  %vm35_vm1 = vcmp.ge.f32.partialorder %v31_v11, 0.0  ;;  %v39_v15 = vmul.f32 0.01, %v31_v11 }
   0x8   :  { %vm36_vm2 = vcmp.ge.f32.partialorder %v32_v12, 0.0  ;;  %v40_v16 = vmul.f32 0.01, %v32_v12  ;;  %vm37_vm3 = vcmp.ge.f32.partialorder %v33_v13, 0.0  ;;  %v41_v17 = vmul.f32 0.01, %v33_v13 }
   0x9   :  { %v42_v18 = vsel %vm34_vm0, %v30_v10, %v38_v14  ;;  %v43_v19 = vsel %vm35_vm1, %v31_v11, %v39_v15 }
   0xa   :  { %46 = vst [vmem:[%s109_s3] sm:$0xff] %v42_v18  ;;  %v44_v20 = vsel %vm36_vm2, %v32_v12, %v40_v16  ;;  %v45_v21 = vsel %vm37_vm3, %v33_v13, %v41_v17 }
   0xb   :  { %47 = vst [vmem:[%s109_s3 + $0x8] sm:$0xff] %v43_v19 }
   0xc   :  { %48 = vst [vmem:[%s109_s3 + $0x10] sm:$0xff] %v44_v20 }
   0xd   :  { %49 = vst [vmem:[%s109_s3 + $0x18] sm:$0xff] %v45_v21 }

</bundles_post_ra>
